<compile_context>
chip_gen: v5e
topology: v5e:2x2
jax: 0.10.0
libtpu: 0.0.40
codegen_flags: <defaults>
</compile_context>

<pallas_src>
import jax
import jax.numpy as jnp
from jax.experimental import pallas as pl
from jax.experimental.pallas import tpu as pltpu


def _round_up(x, m):
    return ((x + m - 1) // m) * m


def _critic_kernel(state_ref, action_ref, w1_ref, b1_ref, w2s_ref, w2a_ref,
                   b2_ref, w3_ref, b3_ref, out_ref):
    # Streaming inputs arrive in f32; cast to bf16 on the VPU for the MXU.
    state = state_ref[...].astype(jnp.bfloat16)     # (TM, ns)
    action = action_ref[...].astype(jnp.bfloat16)   # (TM, na)

    # Layer 1: Linear(ns -> h1) + ReLU  (bf16 MXU operands, f32 accumulate)
    x = jnp.dot(state, w1_ref[...],
                preferred_element_type=jnp.float32) + b1_ref[...]
    x = jnp.maximum(x, 0.0)

    # Layer 2: Linear(h1 + na -> h2) + ReLU
    # concat([x, action]) @ W2  ==  x @ W2[:h1] + action @ W2[h1:]
    h = (jnp.dot(x.astype(jnp.bfloat16), w2s_ref[...],
                 preferred_element_type=jnp.float32)
         + jnp.dot(action, w2a_ref[...],
                   preferred_element_type=jnp.float32)
         + b2_ref[...])
    h = jnp.maximum(h, 0.0)                          # (TM, h2), f32

    # Layer 3: Linear(h2 -> 1), contracted so the result lands directly in a
    # lane-dense (1, TM) block (batch on lanes) -> unmasked HBM store.
    hb = h.astype(jnp.bfloat16)
    q = jnp.einsum('od,td->ot', w3_ref[...], hb,
                   preferred_element_type=jnp.float32)   # (1, TM)
    out_ref[...] = q + b3_ref[...]                       # (1,1) broadcast


def _choose_tile(B, block_rows):
    """Pick the batch tile TM.

    - small batches: one tile, rounded to the 8-sublane granule;
    - B >= 256: tile is a multiple of 128 (lane-dense output blocks) and we
      keep >= 2 grid steps so the "parallel" axis shards across v7x's 2 TCs.
    """
    if B < 256:
        return _round_up(B, 8)
    n_steps = max(2, pl.cdiv(B, block_rows))
    return min(block_rows, _round_up(pl.cdiv(B, n_steps), 128))


def critic_forward(state, action, params, *, block_rows=4096):
    """state: (B, num_states), action: (B, num_actions) -> (B, 1) float32."""
    B, num_states = state.shape
    num_actions = action.shape[1]
    h1 = params["w1"].shape[1]
    h2 = params["w2s"].shape[1]

    block_rows = _round_up(block_rows, 128)
    TM = _choose_tile(B, block_rows)
    nb = pl.cdiv(B, TM)
    Bp = nb * TM   # ragged last tile handled by Pallas partial-block reads

    # Tiny weights: bf16 for MXU operands, f32 biases.  They stay VMEM
    # resident across the batch grid via constant index_maps.
    w1 = params["w1"].astype(jnp.bfloat16)
    w2s = params["w2s"].astype(jnp.bfloat16)
    w2a = params["w2a"].astype(jnp.bfloat16)
    w3 = params["w3"].reshape(1, h2).astype(jnp.bfloat16)
    b1 = params["b1"].astype(jnp.float32)
    b2 = params["b2"].astype(jnp.float32)
    b3 = params["b3"].astype(jnp.float32)

    const = lambda i: (0, 0)

    flops = 2 * B * (num_states * h1 + (h1 + num_actions) * h2 + h2)
    bytes_accessed = (B * (num_states + num_actions) * 4       # inputs (f32)
                      + B * 4                                   # output (f32)
                      + (num_states * h1 + h1 * h2 + num_actions * h2 + h2) * 2
                      + (h1 + h2 + 1) * 4)                      # biases

    out = pl.pallas_call(
        _critic_kernel,
        out_shape=jax.ShapeDtypeStruct((1, Bp), jnp.float32),
        grid=(nb,),
        in_specs=[
            pl.BlockSpec((TM, num_states), lambda i: (i, 0)),   # state
            pl.BlockSpec((TM, num_actions), lambda i: (i, 0)),  # action
            pl.BlockSpec((num_states, h1), const),              # w1
            pl.BlockSpec((1, h1), const),                       # b1
            pl.BlockSpec((h1, h2), const),                      # w2 (x part)
            pl.BlockSpec((num_actions, h2), const),             # w2 (action)
            pl.BlockSpec((1, h2), const),                       # b2
            pl.BlockSpec((1, h2), const),                       # w3 row
            pl.BlockSpec((1, 1), const),                        # b3
        ],
        out_specs=pl.BlockSpec((1, TM), lambda i: (0, i)),      # lane-dense q
        compiler_params=pltpu.CompilerParams(
            dimension_semantics=("parallel",),
            vmem_limit_bytes=32 * 1024 * 1024),
        cost_estimate=pl.CostEstimate(flops=flops, transcendentals=0,
                                      bytes_accessed=bytes_accessed),
    )(state, action, w1, b1, w2s, w2a, b2, w3, b3)

    return out[0, :B][:, None]


def init_params(key, num_states, num_actions, h1, h2):
    """PyTorch-Linear-like init (uniform +-1/sqrt(fan_in)); weights stored
    already transposed so y = x @ W + b.  Layer-2 weight is split along its
    input axis into the [x ; action] parts."""
    ks = jax.random.split(key, 3)

    def lin(k, fan_in, fan_out):
        bound = 1.0 / jnp.sqrt(fan_in)
        kw, kb = jax.random.split(k)
        w = jax.random.uniform(kw, (fan_in, fan_out), jnp.float32, -bound, bound)
        b = jax.random.uniform(kb, (1, fan_out), jnp.float32, -bound, bound)
        return w, b

    w1, b1 = lin(ks[0], num_states, h1)
    w2, b2 = lin(ks[1], h1 + num_actions, h2)
    w3, b3 = lin(ks[2], h2, 1)
    return {
        "w1": w1, "b1": b1,
        "w2s": w2[:h1, :], "w2a": w2[h1:, :], "b2": b2,
        "w3": w3, "b3": b3,
    }


def critic_ref(state, action, params, compute_dtype=jnp.float32):
    """Pure-JAX reference.  compute_dtype=bf16 mirrors the kernel's operand
    casting (f32 accumulation either way)."""
    s = state.astype(compute_dtype)
    a = action.astype(compute_dtype)
    w1 = params["w1"].astype(compute_dtype)
    w2s = params["w2s"].astype(compute_dtype)
    w2a = params["w2a"].astype(compute_dtype)
    w3 = params["w3"].astype(compute_dtype)
    x = jnp.maximum(
        jnp.dot(s, w1, preferred_element_type=jnp.float32) + params["b1"], 0.0)
    h = jnp.maximum(
        jnp.dot(x.astype(compute_dtype), w2s, preferred_element_type=jnp.float32)
        + jnp.dot(a, w2a, preferred_element_type=jnp.float32)
        + params["b2"], 0.0)
    return (jnp.dot(h.astype(compute_dtype), w3,
                    preferred_element_type=jnp.float32) + params["b3"])


if __name__ == "__main__":
    num_states, num_actions = 4, 2
    num_hidden_l1, num_hidden_l2 = 32, 32

    key = jax.random.PRNGKey(0)
    k_params, k_state, k_action = jax.random.split(key, 3)
    params = init_params(k_params, num_states, num_actions,
                         num_hidden_l1, num_hidden_l2)

    # --- small smoke test (single grid step, lane-sparse tiny output) ---
    batch = 8
    state = jax.random.normal(k_state, (batch, num_states), jnp.float32)
    action = jax.random.normal(k_action, (batch, num_actions), jnp.float32)

    out = jax.block_until_ready(critic_forward(state, action, params))
    assert out.shape == (batch, 1)
    ref_bf16 = critic_ref(state, action, params, compute_dtype=jnp.bfloat16)
    ref_f32 = critic_ref(state, action, params, compute_dtype=jnp.float32)
    assert jnp.allclose(out, ref_bf16, atol=1e-3, rtol=1e-3), (out, ref_bf16)
    assert jnp.allclose(out, ref_f32, atol=1e-1, rtol=1e-1), (out, ref_f32)

    # --- larger batch: exercises the 2-step batch grid and the ragged tile ---
    batch2 = 2051  # not a multiple of the tile -> partial last block
    k_s2, k_a2 = jax.random.split(jax.random.PRNGKey(1))
    state2 = jax.random.normal(k_s2, (batch2, num_states), jnp.float32)
    action2 = jax.random.normal(k_a2, (batch2, num_actions), jnp.float32)

    out2 = jax.block_until_ready(critic_forward(state2, action2, params))
    assert out2.shape == (batch2, 1)
    ref2_bf16 = critic_ref(state2, action2, params, compute_dtype=jnp.bfloat16)
    assert jnp.allclose(out2, ref2_bf16, atol=1e-3, rtol=1e-3)

    print("KERNEL_OK")
</pallas_src>

<mosaic_0001>
module attributes {stable_mosaic.version = 11 : i64} {
  func.func @_critic_kernel(%arg0: i32, %arg1: memref<8x4xf32, #tpu.memory_space<vmem>>, %arg2: memref<8x2xf32, #tpu.memory_space<vmem>>, %arg3: memref<4x32xbf16, #tpu.memory_space<vmem>>, %arg4: memref<1x32xf32, #tpu.memory_space<vmem>>, %arg5: memref<32x32xbf16, #tpu.memory_space<vmem>>, %arg6: memref<2x32xbf16, #tpu.memory_space<vmem>>, %arg7: memref<1x32xf32, #tpu.memory_space<vmem>>, %arg8: memref<1x32xbf16, #tpu.memory_space<vmem>>, %arg9: memref<1x1xf32, #tpu.memory_space<vmem>>, %arg10: memref<1x8xf32, #tpu.memory_space<vmem>>) attributes {dimension_semantics = [#tpu.dimension_semantics<parallel>], iteration_bounds = array<i64: 1>, scalar_prefetch = 0 : i64, scratch_operands = 0 : i64, tpu.core_type = #tpu.core_type<tc>, window_params = [{transform_indices = @transform_0, window_bounds = array<i64: 8, 4>}, {transform_indices = @transform_1, window_bounds = array<i64: 8, 2>}, {pipeline_mode = #tpu.pipeline_mode<synchronous>, transform_indices = @transform_2, window_bounds = array<i64: 4, 32>}, {pipeline_mode = #tpu.pipeline_mode<synchronous>, transform_indices = @transform_3, window_bounds = array<i64: 1, 32>}, {pipeline_mode = #tpu.pipeline_mode<synchronous>, transform_indices = @transform_4, window_bounds = array<i64: 32, 32>}, {pipeline_mode = #tpu.pipeline_mode<synchronous>, transform_indices = @transform_5, window_bounds = array<i64: 2, 32>}, {pipeline_mode = #tpu.pipeline_mode<synchronous>, transform_indices = @transform_6, window_bounds = array<i64: 1, 32>}, {pipeline_mode = #tpu.pipeline_mode<synchronous>, transform_indices = @transform_7, window_bounds = array<i64: 1, 32>}, {pipeline_mode = #tpu.pipeline_mode<synchronous>, transform_indices = @transform_8, window_bounds = array<i64: 1, 1>}, {transform_indices = @transform_9, window_bounds = array<i64: 1, 8>}]} {
    %c0 = arith.constant 0 : index
    %c0_0 = arith.constant 0 : index
    %0 = vector.load %arg1[%c0, %c0_0] : memref<8x4xf32, #tpu.memory_space<vmem>>, vector<8x4xf32>
    %1 = arith.truncf %0 : vector<8x4xf32> to vector<8x4xbf16>
    %c0_1 = arith.constant 0 : index
    %c0_2 = arith.constant 0 : index
    %2 = vector.load %arg2[%c0_1, %c0_2] : memref<8x2xf32, #tpu.memory_space<vmem>>, vector<8x2xf32>
    %3 = arith.truncf %2 : vector<8x2xf32> to vector<8x2xbf16>
    %c0_3 = arith.constant 0 : index
    %c0_4 = arith.constant 0 : index
    %4 = vector.load %arg3[%c0_3, %c0_4] : memref<4x32xbf16, #tpu.memory_space<vmem>>, vector<4x32xbf16>
    %cst = arith.constant dense<0.000000e+00> : vector<8x32xf32>
    %5 = tpu.matmul %1, %4, %cst {dimension_numbers = #tpu.dot_dimension_numbers<[1], [0], [0], [1], [0, 0, 1, 1], [], []>} : vector<8x4xbf16>, vector<4x32xbf16>, vector<8x32xf32> -> vector<8x32xf32>
    %c0_5 = arith.constant 0 : index
    %c0_6 = arith.constant 0 : index
    %6 = vector.load %arg4[%c0_5, %c0_6] : memref<1x32xf32, #tpu.memory_space<vmem>>, vector<1x32xf32>
    %7 = vector.broadcast %6 : vector<1x32xf32> to vector<8x32xf32>
    %8 = arith.addf %5, %7 : vector<8x32xf32>
    %cst_7 = arith.constant 0.000000e+00 : f32
    %9 = vector.broadcast %cst_7 : f32 to vector<8x32xf32>
    %10 = arith.maximumf %8, %9 : vector<8x32xf32>
    %11 = arith.truncf %10 : vector<8x32xf32> to vector<8x32xbf16>
    %c0_8 = arith.constant 0 : index
    %c0_9 = arith.constant 0 : index
    %12 = vector.load %arg5[%c0_8, %c0_9] : memref<32x32xbf16, #tpu.memory_space<vmem>>, vector<32x32xbf16>
    %cst_10 = arith.constant dense<0.000000e+00> : vector<8x32xf32>
    %13 = tpu.matmul %11, %12, %cst_10 {dimension_numbers = #tpu.dot_dimension_numbers<[1], [0], [0], [1], [0, 0, 1, 1], [], []>} : vector<8x32xbf16>, vector<32x32xbf16>, vector<8x32xf32> -> vector<8x32xf32>
    %c0_11 = arith.constant 0 : index
    %c0_12 = arith.constant 0 : index
    %14 = vector.load %arg6[%c0_11, %c0_12] : memref<2x32xbf16, #tpu.memory_space<vmem>>, vector<2x32xbf16>
    %cst_13 = arith.constant dense<0.000000e+00> : vector<8x32xf32>
    %15 = tpu.matmul %3, %14, %cst_13 {dimension_numbers = #tpu.dot_dimension_numbers<[1], [0], [0], [1], [0, 0, 1, 1], [], []>} : vector<8x2xbf16>, vector<2x32xbf16>, vector<8x32xf32> -> vector<8x32xf32>
    %16 = arith.addf %13, %15 : vector<8x32xf32>
    %c0_14 = arith.constant 0 : index
    %c0_15 = arith.constant 0 : index
    %17 = vector.load %arg7[%c0_14, %c0_15] : memref<1x32xf32, #tpu.memory_space<vmem>>, vector<1x32xf32>
    %18 = vector.broadcast %17 : vector<1x32xf32> to vector<8x32xf32>
    %19 = arith.addf %16, %18 : vector<8x32xf32>
    %cst_16 = arith.constant 0.000000e+00 : f32
    %20 = vector.broadcast %cst_16 : f32 to vector<8x32xf32>
    %21 = arith.maximumf %19, %20 : vector<8x32xf32>
    %22 = arith.truncf %21 : vector<8x32xf32> to vector<8x32xbf16>
    %c0_17 = arith.constant 0 : index
    %c0_18 = arith.constant 0 : index
    %23 = vector.load %arg8[%c0_17, %c0_18] : memref<1x32xbf16, #tpu.memory_space<vmem>>, vector<1x32xbf16>
    "tpu.trace_start"() <{level = 10 : i32, message = "od,td->ot"}> : () -> ()
    %cst_19 = arith.constant dense<0.000000e+00> : vector<1x8xf32>
    %24 = tpu.matmul %23, %22, %cst_19 {dimension_numbers = #tpu.dot_dimension_numbers<[1], [1], [0], [0], [0, 0, 1, 0], [], []>} : vector<1x32xbf16>, vector<8x32xbf16>, vector<1x8xf32> -> vector<1x8xf32>
    "tpu.trace_stop"() : () -> ()
    %c0_20 = arith.constant 0 : index
    %c0_21 = arith.constant 0 : index
    %25 = vector.load %arg9[%c0_20, %c0_21] : memref<1x1xf32, #tpu.memory_space<vmem>>, vector<1x1xf32>
    %26 = vector.broadcast %25 : vector<1x1xf32> to vector<1x8xf32>
    %27 = arith.addf %24, %26 : vector<1x8xf32>
    %c0_22 = arith.constant 0 : index
    %c0_23 = arith.constant 0 : index
    %28 = vector.load %arg10[%c0_22, %c0_23] : memref<1x8xf32, #tpu.memory_space<vmem>>, vector<1x8xf32>
    tpu.vector_store %arg10[%c0_22, %c0_23], %27 {strides = array<i32>} : memref<1x8xf32, #tpu.memory_space<vmem>>, vector<1x8xf32>,
    return
  }
  func.func @transform_0(%arg0: i32) -> (i32, i32) {
    %c0_i32 = arith.constant 0 : i32
    %c0_i32_0 = arith.constant 0 : i32
    return %arg0, %c0_i32 : i32, i32
  }
  func.func @transform_1(%arg0: i32) -> (i32, i32) {
    %c0_i32 = arith.constant 0 : i32
    %c0_i32_0 = arith.constant 0 : i32
    return %arg0, %c0_i32 : i32, i32
  }
  func.func @transform_2(%arg0: i32) -> (i32, i32) {
    %c0_i32 = arith.constant 0 : i32
    %c0_i32_0 = arith.constant 0 : i32
    %c0_i32_1 = arith.constant 0 : i32
    return %c0_i32, %c0_i32_0 : i32, i32
  }
  func.func @transform_3(%arg0: i32) -> (i32, i32) {
    %c0_i32 = arith.constant 0 : i32
    %c0_i32_0 = arith.constant 0 : i32
    %c0_i32_1 = arith.constant 0 : i32
    return %c0_i32, %c0_i32_0 : i32, i32
  }
  func.func @transform_4(%arg0: i32) -> (i32, i32) {
    %c0_i32 = arith.constant 0 : i32
    %c0_i32_0 = arith.constant 0 : i32
    %c0_i32_1 = arith.constant 0 : i32
    return %c0_i32, %c0_i32_0 : i32, i32
  }
  func.func @transform_5(%arg0: i32) -> (i32, i32) {
    %c0_i32 = arith.constant 0 : i32
    %c0_i32_0 = arith.constant 0 : i32
    %c0_i32_1 = arith.constant 0 : i32
    return %c0_i32, %c0_i32_0 : i32, i32
  }
  func.func @transform_6(%arg0: i32) -> (i32, i32) {
    %c0_i32 = arith.constant 0 : i32
    %c0_i32_0 = arith.constant 0 : i32
    %c0_i32_1 = arith.constant 0 : i32
    return %c0_i32, %c0_i32_0 : i32, i32
  }
  func.func @transform_7(%arg0: i32) -> (i32, i32) {
    %c0_i32 = arith.constant 0 : i32
    %c0_i32_0 = arith.constant 0 : i32
    %c0_i32_1 = arith.constant 0 : i32
    return %c0_i32, %c0_i32_0 : i32, i32
  }
  func.func @transform_8(%arg0: i32) -> (i32, i32) {
    %c0_i32 = arith.constant 0 : i32
    %c0_i32_0 = arith.constant 0 : i32
    %c0_i32_1 = arith.constant 0 : i32
    return %c0_i32, %c0_i32_0 : i32, i32
  }
  func.func @transform_9(%arg0: i32) -> (i32, i32) {
    %c0_i32 = arith.constant 0 : i32
    %c0_i32_0 = arith.constant 0 : i32
    return %c0_i32, %arg0 : i32, i32
  }
}

</mosaic_0001>

<bundles_post_ra>
// kernel: tpu_custom_call.1
= control target key start
LH: loop header
LB: loop body
LE: loop exit
PB: predicated region body
PF: predicated region fallthrough
CT: control target
= control target key end

     0   :  { %s308_s0 = inlined_call_operand.vmem [shape: f32[8,4], index: 0, kind: input, shape index: {}]   ;;  %s309_s1 = inlined_call_operand.vmem [shape: f32[8,2], index: 1, kind: input, shape index: {}]   ;;  %s310_s2 = inlined_call_operand.vmem [shape: bf16[4,32], index: 2, kind: input, shape index: {}]   ;;  %s311_s3 = inlined_call_operand.vmem [shape: f32[1,32], index: 3, kind: input, shape index: {}]   ;;  %s312_s4 = inlined_call_operand.vmem [shape: bf16[32,32], index: 4, kind: input, shape index: {}]   ;;  %s313_s5 = inlined_call_operand.vmem [shape: bf16[2,32], index: 5, kind: input, shape index: {}]   ;;  %s314_s6 = inlined_call_operand.vmem [shape: f32[1,32], index: 6, kind: input, shape index: {}]   ;;  %s315_s7 = inlined_call_operand.vmem [shape: bf16[1,32], index: 7, kind: input, shape index: {}]   ;;  %s316_s8 = inlined_call_operand.<no memory space> [shape: f32[1,1], index: 8, kind: input, shape index: {}]   ;;  %s317_s9 = inlined_call_operand.hbm [shape: f32[1,8], index: 9, kind: output, shape index: {}]  }
   0x1   :  { %v14_v0 = vstv %s316_s8 }
   0x2   :  { %15 = vst [vmem:[#allocation2] sm:$0x1] %v14_v0 }
   0x3   :  { %v40_v1 = vld [vmem:[%s310_s2] sm:$0x3]  ;;  %vm49_vm0 = vcmask 1041408   ;;  %vm45_vm1 = vcmask 31744  }
   0x4   :  { %v36_v2 = vld [vmem:[%s308_s0] sm:$0xff]  ;;  %v51_v3 = vsel %vm49_vm0, %v40_v1, 0 }
   0x5   :  { %v37_v4 = vpack.c.bf16 %v36_v2, %v36_v2  ;;  %60 = vmatpush.bf16.msra.mxu0 %v51_v3 }
   0x6   :  { %16 = vsyncpa [#allocation4], 0  ;;  %v188_v5 = vld [vmem:[%s312_s4 + $0x8] sm:$0xff]  ;;  %v72_v6 = vld [vmem:[%s313_s5] sm:$0x1]  ;;  %vm77_vm2 = vcmask 1040384  }
   0x7   :  { %116 = vmatpush.bf16.msra.mxu2 %v188_v5  ;;  %v79_v7 = vsel %vm77_vm2, %v72_v6, 0  ;;  %v187_v8 = vld [vmem:[%s312_s4] sm:$0xff]  ;;  %vm73_vm3 = vcmask 15360   ;;  %vm106_vm4 = vcmask 261120   ;;  %v220_v20 = vmov 0   ;;  %s221_s22 = smov [#allocation3]  }
   0x8   :  { %175 = vmatmul.msk.bf16.vlgmr.msra.gmra.mxu0 %vm45_vm1, %v37_v4  ;;  %88 = vmatpush.bf16.msra.mxu1 %v79_v7  ;;  %v38_v9 = vld [vmem:[%s309_s1] sm:$0xff]  ;;  %s164_s23 = sshll.u32 %s221_s22, 4  ;;  %s166_s25 = sshll.u32 %s317_s9, 4  ;;  %vm157_vm5 = vcmask 57344   ;;  %s165_s23 = int_to_ptr.vmem [resolvable:$true] %s164_s23  ;;  %s167_s25 = int_to_ptr.hbm [resolvable:$true] %s166_s25 }
   0x9   :  { %v39_v10 = vpack.c.bf16 %v38_v9, %v38_v9  ;;  %v192_v11 = vld [vmem:[%s311_s3] ss:$0 sm:$0xff]  ;;  %191 = vset.pattern.permute.xlu0 %v220_v20 }
   0xa   :  { %v131_v19 = vld [vmem:[#allocation2] sm:$0x1] }
   0xb   :  { %117 = vmatpush.bf16.msra.mxu2 %v187_v8  ;;  %176 = vmatmul.msk.bf16.vlgmr.msra.gmra.mxu1 %vm73_vm3, %v39_v10  ;;  %v193_v21 = vld [vmem:[%s314_s6] ss:$0 sm:$0xff] }
   0xc   :  { %134 = vperm.xlu0 %191, %v131_v19   ;;  %v130_v29 = vld [vmem:[%s315_s7] sm:$0x1] }
  0x7e   :  { %v135_v30 = vpop.permute.xlu0 %134 }
  0x7f   :  { %v137_v31 = vperm.slane %v135_v30, 0 }
  0x85   :  { %v62_v12 = vpop.f32.mrf.mxu0 }
  0x86   :  { %v63_v13 = vadd.f32 %v192_v11, %v62_v12 }
  0x88   :  { %v66_v14 = vmax.f32 %v63_v13, 0.0  ;;  %v90_v17 = vpop.f32.mrf.mxu1 }
  0x8a   :  { %v67_v15 = vpack.c.bf16 %v66_v14, %v66_v14 }
  0x8c   :  { %185 = vmatmul.msk.bf16.vlgmr.msra.gmra.mxu2 %vm106_vm4, %v67_v15 }
  0x8d   :  { %v64_v16 = vpop.f32.mrf.mxu0 }
  0x90   :  { %v92_v18 = vpop.f32.mrf.mxu1 }
 0x10f   :  { %v119_v22 = vpop.f32.mrf.mxu2 }
 0x110   :  { %v120_v23 = vadd.f32 %v119_v22, %v90_v17 }
 0x112   :  { %v127_v24 = vadd.f32 %v193_v21, %v120_v23 }
 0x114   :  { %v128_v25 = vmax.f32 %v127_v24, 0.0 }
 0x116   :  { %v129_v26 = vpack.c.bf16 %v128_v25, %v128_v25 }
 0x117   :  { %v121_v27 = vpop.f32.mrf.mxu2 }
 0x118   :  { %v142_v28 = vsel %vm106_vm4, %v129_v26, 0 }
 0x119   :  { %151 = vmatpush.bf16.xpose.msra.mxu3 %v142_v28 }
 0x120   :  { %186 = vmatmul.msk.bf16.vlgmr.msra.gmra.mxu3 %vm106_vm4, %v130_v29 }
 0x1a3   :  { %v153_v32 = vpop.f32.mrf.mxu3 }
 0x1a4   :  { %v154_v33 = vadd.f32 %v153_v32, %v137_v31 }
 0x1a6   :  { %158 = vst.msk [vmem:[#allocation3] sm:$0x1] %vm157_vm5, %v154_v33 }
 0x1a7   :  { %169 = dma.vmem_to_hbm [thread:$0]  %s165_s23, 16, %s167_s25, [#allocation4]  }
 0x1ab   :  { %v155_v34 = vpop.f32.mrf.mxu3 }
 0x1ac   :  { %218 = dma.done.wait [#allocation4], 16  }
 0x1ad   :  { %219 = vsyncadd [#allocation4], 4294967280 }
 0x1ae   :  { %174 = vsyncpa [#allocation4], 1 }

</bundles_post_ra>
